<compile_context>
chip_gen: v6e
topology: v6e:2x2x1
jax: 0.10.0
libtpu: 0.0.40
codegen_flags: <defaults>
</compile_context>

<pallas_src>
import functools

import jax
import jax.numpy as jnp
from jax.experimental import pallas as pl
from jax.experimental.pallas import tpu as pltpu


# Rows of the packed (8, 128) per-accumulator output block.
_KL_ROW, _MSUM_ROW, _MMAX_ROW, _SSUM_ROW, _SMAX_ROW = 0, 1, 2, 3, 4


# ----------------------------------------------------------------------------
# VMEM budgeting (generation aware)
# ----------------------------------------------------------------------------
def _vmem_limit_bytes():
    """Scoped-VMEM limit: v5e/v6e have 128 MiB physical VMEM -> 64 MiB scoped;
    v7x has only 64 MiB physical -> 40 MiB scoped so double-buffered inputs,
    f32 temporaries and compiler scratch always fit."""
    try:
        cap = pltpu.get_tpu_info().vmem_capacity_bytes
    except Exception:                       # non-TPU trace / API drift
        cap = 64 * 1024 * 1024              # conservative: assume v7x
    if cap >= 100 * 1024 * 1024:
        return 64 * 1024 * 1024             # v5e / v6e
    return 40 * 1024 * 1024                 # v7x


def _choose_tile(total, gran, unit_bytes, vmem_limit):
    """Largest tile (in last-axis units) that divides `total`, is a multiple of
    `gran`, and keeps (4 inputs x 2 pipeline buffers, native dtype) + ~6
    f32-tile temporaries under ~60% of the scoped VMEM limit."""
    budget = int(0.6 * vmem_limit)
    max_t = max(gran, budget // max(1, unit_bytes))
    if max_t >= total:
        # Whole axis fits in one block: split it in two so both v7x
        # TensorCores get an independent ("parallel") half.  No-op on v5e/v6e.
        half = total // 2
        if total % 2 == 0 and half >= gran and half % gran == 0:
            return half
        return total
    t = (max_t // gran) * gran
    while t >= gran:
        if total % t == 0:
            return t
        t -= gran
    return total  # no legal divisor fits; fall back to the whole axis


# ----------------------------------------------------------------------------
# Pallas kernel: fused KL + summary statistics for ONE latent layer
# ----------------------------------------------------------------------------
def _geco_kernel(hi_ref, wgt_ref, zm_ref, zs_ref, pm_ref, ps_ref, out_ref, *,
                 tile, lo):
    h = pl.program_id(0)                    # parallel half (megacore)
    step = pl.program_id(1)                 # reduction step
    n_steps = pl.num_programs(1)

    # Per-half accumulator lives in the output block (same block index across
    # the reduction axis -> VMEM resident, written back when `h` changes).
    @pl.when(step == 0)
    def _init():
        out_ref[...] = jnp.zeros_like(out_ref)

    zm = zm_ref[...].astype(jnp.float32)
    zs = zs_ref[...].astype(jnp.float32)
    pm = pm_ref[...].astype(jnp.float32)
    ps = ps_ref[...].astype(jnp.float32)
    B = zm.shape[0]

    # Fused summary statistics (single pass over data already in vregs).
    # (Optional further trim on v6e/v7x: take the maxes on the native bf16
    #  values before the f32 upcast.)
    szm = jnp.sum(zm)
    mzm = jnp.max(jnp.abs(zm))
    szs = jnp.sum(zs)
    mzs = jnp.max(zs)                       # stddev >= 0: abs dropped

    # KL(p_z || z) for diagonal Normals (torch.distributions closed form):
    #   0.5 * (var_ratio + t1 - 1 - log(var_ratio))
    # The 0.5 and the 1/(B*trg_len) normalisation are folded into `wgt`; the
    # "-1" term is dropped here and restored on the host as -0.5*D.
    inv_zs = 1.0 / zs
    vr = (ps * inv_zs) ** 2
    t1 = ((pm - zm) * inv_zs) ** 2
    kl_el = vr + t1 - jnp.log(vr)

    # Sequence mask rebuilt from an int32 iota and precomputed per-batch
    # bounds.  On the flat ([B, S*D]) path the bounds are in flat-element
    # units, so no per-element division by D is ever needed.
    pos = ((h * n_steps + step) * tile
           + jax.lax.broadcasted_iota(jnp.int32, (B, tile), 1))
    weight = jnp.where((pos >= lo) & (pos < hi_ref[...]), wgt_ref[...], 0.0)

    if kl_el.ndim == 3:                     # (B, tile_s, D): weight per (b, s)
        kl_part = jnp.sum(jnp.sum(kl_el, axis=-1) * weight)
    else:                                   # (B, tile_f): weight per element
        kl_part = jnp.sum(kl_el * weight)

    # Pack the 5 per-tile scalars into the lane-dense (8, 128) accumulator.
    row = jax.lax.broadcasted_iota(jnp.int32, (8, 128), 0)
    contrib = (jnp.where(row == _KL_ROW, kl_part, 0.0)
               + jnp.where(row == _MSUM_ROW, szm, 0.0)
               + jnp.where(row == _MMAX_ROW, mzm, 0.0)
               + jnp.where(row == _SSUM_ROW, szs, 0.0)
               + jnp.where(row == _SMAX_ROW, mzs, 0.0))
    is_sum_row = (row == _KL_ROW) | (row == _MSUM_ROW) | (row == _SSUM_ROW)
    acc = out_ref[0]
    out_ref[0] = jnp.where(is_sum_row, acc + contrib, jnp.maximum(acc, contrib))


def geco_kl_layer_pallas(z_mean, z_std, p_mean, p_std, trg_len, pad_off=0, *,
                         tile=None):
    """One latent layer: (B, S, D) stats in native dtype (bf16/f32).

    Returns 5 f32 scalars: (kl, mean, mean_max, stddev_mean, stddev_max)."""
    B, S, D = z_mean.shape
    itemsize = jnp.dtype(z_mean.dtype).itemsize
    vmem_limit = _vmem_limit_bytes()
    # Per last-axis-unit VMEM bytes: 4 inputs x 2 pipeline buffers (native
    # dtype) + ~6 f32-tile temporaries (upcasts + KL intermediates).
    unit = 4 * 2 * itemsize + 6 * 4

    tlen_i = jnp.ceil(trg_len.astype(jnp.float32)).astype(jnp.int32).reshape(B, 1)
    wgt = (0.5 / (jnp.float32(B) * trg_len.astype(jnp.float32))).reshape(B, 1)

    lane_dense = (D % 128 == 0)
    if lane_dense:
        # D already fills whole 128-lane vregs: (B, tile_s, D) blocks with
        # cheap per-(b, s) weighting (minimal VALU work, matters on v7x).
        total = S
        gran = 8 if itemsize >= 4 else (16 if itemsize == 2 else 32)
        unit_bytes = B * D * unit
        lo, hi = pad_off, pad_off + tlen_i
        stats = (z_mean, z_std, p_mean, p_std)
    else:
        # D < 128 (e.g. 32): fold D into the lane axis via a [B, S*D] view
        # (free bitcast reshape inside jit) so vregs are lane/sublane dense.
        total = S * D
        gran = 128
        unit_bytes = B * unit
        lo, hi = pad_off * D, (pad_off + tlen_i) * D
        stats = tuple(a.reshape(B, S * D) for a in (z_mean, z_std, p_mean, p_std))

    if tile is None:
        tile = _choose_tile(total, gran, unit_bytes, vmem_limit)
    assert total % tile == 0 and (tile % gran == 0 or tile == total), \
        (total, tile, gran)

    n_blocks = total // tile
    n_par = 2 if (n_blocks >= 2 and n_blocks % 2 == 0) else 1
    n_steps = n_blocks // n_par

    if lane_dense:
        sspec = pl.BlockSpec((B, tile, D), lambda h, s: (0, h * n_steps + s, 0))
    else:
        sspec = pl.BlockSpec((B, tile), lambda h, s: (0, h * n_steps + s))

    in_specs = [
        pl.BlockSpec((B, 1), lambda h, s: (0, 0)),   # hi  (VMEM resident)
        pl.BlockSpec((B, 1), lambda h, s: (0, 0)),   # wgt (VMEM resident)
        sspec, sspec, sspec, sspec,
    ]
    out_spec = pl.BlockSpec((1, 8, 128), lambda h, s: (h, 0, 0))

    kernel = functools.partial(_geco_kernel, tile=tile, lo=lo)
    out = pl.pallas_call(
        kernel,
        out_shape=jax.ShapeDtypeStruct((n_par, 8, 128), jnp.float32),
        grid=(n_par, n_steps),
        in_specs=in_specs,
        out_specs=out_spec,
        compiler_params=pltpu.CompilerParams(
            dimension_semantics=("parallel", "arbitrary"),
            vmem_limit_bytes=vmem_limit),
    )(hi, wgt, *stats)

    n_elem = jnp.float32(B * S * D)
    kl = jnp.sum(out[:, _KL_ROW, 0]) - 0.5 * D       # closed-form "-1" term
    mean = jnp.sum(out[:, _MSUM_ROW, 0]) / n_elem
    mean_max = jnp.max(out[:, _MMAX_ROW, 0])
    std_mean = jnp.sum(out[:, _SSUM_ROW, 0]) / n_elem
    std_max = jnp.max(out[:, _SMAX_ROW, 0])
    return kl, mean, mean_max, std_mean, std_max


# ----------------------------------------------------------------------------
# GECOLoss (host-side glue mirroring the PyTorch module's forward semantics)
# ----------------------------------------------------------------------------
class GECOLossPallas:
    """NOTE: _moving_average mutates Python state (self.t, self.ce_ma) exactly
    like the torch module; it is host-side training-loop bookkeeping and is not
    safe to wrap in jax.jit (the Pallas kernels themselves are pure)."""

    def __init__(self, kappa, lagmul_rate, ma_decay):
        self.kappa = jnp.float32(kappa)
        self.decay = ma_decay
        self.lagmul_rate = lagmul_rate
        # lagmul_init = log(exp(sqrt(1.0)) - 1)  ->  softplus(lagmul) == 1
        self.lagmul = jnp.log(jnp.exp(jnp.sqrt(jnp.float32(1.0))) - 1.0)
        # TODO(synk): scale_gradients registers a backward-pass hook
        # (grad * -lagmul_rate); backward-only, no forward Pallas equivalent.
        self.t = 0
        self.ce_ma = jnp.float32(0.0)

    def _moving_average(self, ce_loss):
        if self.t == 0:
            self.ce_ma = jax.lax.stop_gradient(ce_loss)
            self.t += 1
            return ce_loss
        self.ce_ma = (self.decay * self.ce_ma
                      + (1.0 - self.decay) * jax.lax.stop_gradient(ce_loss))
        self.t += 1
        return ce_loss + jax.lax.stop_gradient(self.ce_ma - ce_loss)

    def forward(self, crit_set, trg_set):
        (z_list, p_z_list), ce_loss = crit_set
        trg_seq, trg_len = trg_set
        S_trg = trg_seq.shape[1]
        S_lat = z_list[0][0].shape[1]
        # mask = arange(S_trg) < trg_len, right-aligned into the latent seq
        # ("large_mask"); realized inside the kernel via this static offset.
        pad_off = S_lat - S_trg

        # One pallas_call per layer in native dtype: no jnp.stack, every stat
        # tensor is read from HBM exactly once by its own kernel.
        kls, mms, mxs, sms, sxs = [], [], [], [], []
        for (zm, zs), (pm, ps) in zip(z_list, p_z_list):
            kl, mm, mx, sm, sx = geco_kl_layer_pallas(
                zm, zs, pm, ps, trg_len, pad_off)
            kls.append(kl); mms.append(mm); mxs.append(mx)
            sms.append(sm); sxs.append(sx)

        kl_loss = jnp.sum(jnp.stack(kls))
        ma_ce_loss = self._moving_average(ce_loss)
        rec_constraint = ma_ce_loss - self.kappa
        lamb = jax.nn.softplus(self.lagmul) ** 2
        loss = lamb * rec_constraint + kl_loss

        summary = {
            'mean_list': mms,
            'stddev_list': sms,
            'mean_max_list': mxs,
            'stddev_max_list': sxs,
            'kl_loss': jax.lax.stop_gradient(kl_loss),
            'ce_loss': jax.lax.stop_gradient(ce_loss),
            'lagmul': self.lagmul,
            'ma_ce_loss': jax.lax.stop_gradient(ma_ce_loss),
            'rec_constraint': jax.lax.stop_gradient(rec_constraint),
            'lamb': lamb,
            't': self.t,
        }
        return loss, summary


# ----------------------------------------------------------------------------
# Pure-JAX reference (correctness sanity checks)
# ----------------------------------------------------------------------------
def _reference_layer(zm, zs, pm, ps, trg_len, pad_off):
    zm = zm.astype(jnp.float32)
    zs = zs.astype(jnp.float32)
    pm = pm.astype(jnp.float32)
    ps = ps.astype(jnp.float32)
    S = zm.shape[1]
    pos = jnp.arange(S, dtype=jnp.float32)[None, :] - pad_off
    mask = ((pos >= 0) & (pos < trg_len[:, None])).astype(jnp.float32)
    vr = (ps / zs) ** 2
    t1 = ((pm - zm) / zs) ** 2
    kl = 0.5 * (vr + t1 - 1.0 - jnp.log(vr))
    kl = kl.sum(-1) * mask
    kl = (kl.sum(-1) / trg_len).mean()
    return (kl, jnp.mean(zm), jnp.max(jnp.abs(zm)),
            jnp.mean(zs), jnp.max(jnp.abs(zs)))


# ----------------------------------------------------------------------------
if __name__ == "__main__":
    key = jax.random.PRNGKey(0)

    # ---- test 1: full GECOLoss forward, f32, D=32 (lane-folded flat path) ---
    L, B, S, D = 2, 2, 8, 32
    keys = jax.random.split(key, 4 * L + 2)
    z_list, p_z_list = [], []
    for l in range(L):
        zm = jax.random.normal(keys[4 * l + 0], (B, S, D), jnp.float32)
        zs = jax.nn.softplus(jax.random.normal(keys[4 * l + 1], (B, S, D))) + 0.1
        pm = 0.5 * jax.random.normal(keys[4 * l + 2], (B, S, D), jnp.float32)
        ps = jax.nn.softplus(jax.random.normal(keys[4 * l + 3], (B, S, D))) + 0.1
        z_list.append((zm, zs))
        p_z_list.append((pm, ps))
    trg_seq = jax.random.randint(keys[-2], (B, S), 0, 10).astype(jnp.int32)
    trg_len = jnp.array([8.0, 5.0], dtype=jnp.float32)
    ce_loss = jnp.abs(jax.random.normal(keys[-1], (), jnp.float32)) + 1.0

    geco = GECOLossPallas(kappa=0.1, lagmul_rate=0.01, ma_decay=0.99)
    loss, summary = geco.forward(((z_list, p_z_list), ce_loss), (trg_seq, trg_len))
    loss = jax.block_until_ready(loss)

    refs = [_reference_layer(zm, zs, pm, ps, trg_len, 0)
            for (zm, zs), (pm, ps) in zip(z_list, p_z_list)]
    r_kl = jnp.stack([r[0] for r in refs])
    r_mm = jnp.stack([r[1] for r in refs])
    r_mx = jnp.stack([r[2] for r in refs])
    r_sm = jnp.stack([r[3] for r in refs])
    r_sx = jnp.stack([r[4] for r in refs])
    lamb = jax.nn.softplus(jnp.log(jnp.exp(1.0) - 1.0)) ** 2
    ref_loss = lamb * (ce_loss - jnp.float32(0.1)) + jnp.sum(r_kl)
    assert jnp.allclose(loss, ref_loss, rtol=1e-4, atol=1e-4), (loss, ref_loss)
    assert jnp.allclose(summary['kl_loss'], jnp.sum(r_kl), rtol=1e-4, atol=1e-4)
    assert jnp.allclose(jnp.stack(summary['mean_list']), r_mm, rtol=1e-4, atol=1e-4)
    assert jnp.allclose(jnp.stack(summary['mean_max_list']), r_mx, rtol=1e-4, atol=1e-4)
    assert jnp.allclose(jnp.stack(summary['stddev_list']), r_sm, rtol=1e-4, atol=1e-4)
    assert jnp.allclose(jnp.stack(summary['stddev_max_list']), r_sx, rtol=1e-4, atol=1e-4)

    # ---- test 2: bf16, D=128 (lane-dense 3D path), forced multi-step + split
    B2, S2, D2 = 8, 64, 128
    k2 = jax.random.split(keys[-1], 5)
    zm2 = jax.random.normal(k2[0], (B2, S2, D2)).astype(jnp.bfloat16)
    zs2 = (jax.nn.softplus(jax.random.normal(k2[1], (B2, S2, D2))) + 0.1
           ).astype(jnp.bfloat16)
    pm2 = (0.5 * jax.random.normal(k2[2], (B2, S2, D2))).astype(jnp.bfloat16)
    ps2 = (jax.nn.softplus(jax.random.normal(k2[3], (B2, S2, D2))) + 0.1
           ).astype(jnp.bfloat16)
    trg_len2 = jnp.array([64., 61., 40., 33., 17., 64., 5., 50.], jnp.float32)
    got2 = geco_kl_layer_pallas(zm2, zs2, pm2, ps2, trg_len2, pad_off=0, tile=16)
    got2 = jax.block_until_ready(got2)
    ref2 = _reference_layer(zm2, zs2, pm2, ps2, trg_len2, 0)
    for g, r in zip(got2, ref2):
        assert jnp.allclose(g, r, rtol=2e-3, atol=2e-3), (g, r)

    # ---- test 3: f32, D=32, right-aligned mask (pad_off > 0), flat multi-step
    B3, S3, D3 = 2, 16, 32
    k3 = jax.random.split(k2[4], 4)
    zm3 = jax.random.normal(k3[0], (B3, S3, D3), jnp.float32)
    zs3 = jax.nn.softplus(jax.random.normal(k3[1], (B3, S3, D3))) + 0.1
    pm3 = 0.5 * jax.random.normal(k3[2], (B3, S3, D3), jnp.float32)
    ps3 = jax.nn.softplus(jax.random.normal(k3[3], (B3, S3, D3))) + 0.1
    trg_len3 = jnp.array([10.0, 7.0], jnp.float32)
    got3 = geco_kl_layer_pallas(zm3, zs3, pm3, ps3, trg_len3, pad_off=4, tile=128)
    got3 = jax.block_until_ready(got3)
    ref3 = _reference_layer(zm3, zs3, pm3, ps3, trg_len3, 4)
    for g, r in zip(got3, ref3):
        assert jnp.allclose(g, r, rtol=1e-4, atol=1e-4), (g, r)

    print("KERNEL_OK")
</pallas_src>

<mosaic_0001>
module attributes {stable_mosaic.version = 11 : i64} {
  func.func @_geco_kernel(%arg0: i32, %arg1: i32, %arg2: memref<2x1xi32, #tpu.memory_space<vmem>>, %arg3: memref<2x1xf32, #tpu.memory_space<vmem>>, %arg4: memref<2x128xf32, #tpu.memory_space<vmem>>, %arg5: memref<2x128xf32, #tpu.memory_space<vmem>>, %arg6: memref<2x128xf32, #tpu.memory_space<vmem>>, %arg7: memref<2x128xf32, #tpu.memory_space<vmem>>, %arg8: memref<1x8x128xf32, #tpu.memory_space<vmem>>) attributes {dimension_semantics = [#tpu.dimension_semantics<parallel>, #tpu.dimension_semantics<arbitrary>], iteration_bounds = array<i64: 2, 1>, scalar_prefetch = 0 : i64, scratch_operands = 0 : i64, tpu.core_type = #tpu.core_type<tc>, window_params = [{pipeline_mode = #tpu.pipeline_mode<synchronous>, transform_indices = @transform_0, window_bounds = array<i64: 2, 1>}, {pipeline_mode = #tpu.pipeline_mode<synchronous>, transform_indices = @transform_1, window_bounds = array<i64: 2, 1>}, {transform_indices = @transform_2, window_bounds = array<i64: 2, 128>}, {transform_indices = @transform_3, window_bounds = array<i64: 2, 128>}, {transform_indices = @transform_4, window_bounds = array<i64: 2, 128>}, {transform_indices = @transform_5, window_bounds = array<i64: 2, 128>}, {transform_indices = @transform_6, window_bounds = array<i64: 1, 8, 128>}]} {
    %c0_i32 = arith.constant 0 : i32
    %0 = arith.cmpi eq, %arg1, %c0_i32 : i32
    %1 = arith.extui %0 : i1 to i32
    %c0_i32_0 = arith.constant 0 : i32
    %2 = arith.cmpi ne, %1, %c0_i32_0 : i32
    scf.if %2 {
      %cst_35 = arith.constant 0.000000e+00 : f32
      %102 = vector.broadcast %cst_35 : f32 to vector<1x8x128xf32>
      %c0_36 = arith.constant 0 : index
      %c0_37 = arith.constant 0 : index
      %c0_38 = arith.constant 0 : index
      %103 = vector.load %arg8[%c0_36, %c0_37, %c0_38] : memref<1x8x128xf32, #tpu.memory_space<vmem>>, vector<1x8x128xf32>
      tpu.vector_store %arg8[%c0_36, %c0_37, %c0_38], %102 {strides = array<i32>} : memref<1x8x128xf32, #tpu.memory_space<vmem>>, vector<1x8x128xf32>,
    } else {
    }
    %c0 = arith.constant 0 : index
    %c0_1 = arith.constant 0 : index
    %3 = vector.load %arg4[%c0, %c0_1] : memref<2x128xf32, #tpu.memory_space<vmem>>, vector<2x128xf32>
    %c0_2 = arith.constant 0 : index
    %c0_3 = arith.constant 0 : index
    %4 = vector.load %arg5[%c0_2, %c0_3] : memref<2x128xf32, #tpu.memory_space<vmem>>, vector<2x128xf32>
    %c0_4 = arith.constant 0 : index
    %c0_5 = arith.constant 0 : index
    %5 = vector.load %arg6[%c0_4, %c0_5] : memref<2x128xf32, #tpu.memory_space<vmem>>, vector<2x128xf32>
    %c0_6 = arith.constant 0 : index
    %c0_7 = arith.constant 0 : index
    %6 = vector.load %arg7[%c0_6, %c0_7] : memref<2x128xf32, #tpu.memory_space<vmem>>, vector<2x128xf32>
    %7 = vector.shape_cast %3 : vector<2x128xf32> to vector<1x2x128xf32>
    %cst = arith.constant dense<0.000000e+00> : vector<1xf32>
    %8 = vector.multi_reduction <add>, %7, %cst [1, 2] : vector<1x2x128xf32> to vector<1xf32>
    %9 = vector.shape_cast %8 : vector<1xf32> to vector<1x1x1xf32>
    %10 = vector.extract %9[0, 0, 0] : f32 from vector<1x1x1xf32>
    %11 = math.absf %3 : vector<2x128xf32>
    %12 = vector.shape_cast %11 : vector<2x128xf32> to vector<1x2x128xf32>
    %cst_8 = arith.constant dense<0xFF800000> : vector<1xf32>
    %13 = vector.multi_reduction <maximumf>, %12, %cst_8 [1, 2] : vector<1x2x128xf32> to vector<1xf32>
    %14 = vector.shape_cast %13 : vector<1xf32> to vector<1x1x1xf32>
    %15 = vector.extract %14[0, 0, 0] : f32 from vector<1x1x1xf32>
    %16 = vector.shape_cast %4 : vector<2x128xf32> to vector<1x2x128xf32>
    %cst_9 = arith.constant dense<0.000000e+00> : vector<1xf32>
    %17 = vector.multi_reduction <add>, %16, %cst_9 [1, 2] : vector<1x2x128xf32> to vector<1xf32>
    %18 = vector.shape_cast %17 : vector<1xf32> to vector<1x1x1xf32>
    %19 = vector.extract %18[0, 0, 0] : f32 from vector<1x1x1xf32>
    %20 = vector.shape_cast %4 : vector<2x128xf32> to vector<1x2x128xf32>
    %cst_10 = arith.constant dense<0xFF800000> : vector<1xf32>
    %21 = vector.multi_reduction <maximumf>, %20, %cst_10 [1, 2] : vector<1x2x128xf32> to vector<1xf32>
    %22 = vector.shape_cast %21 : vector<1xf32> to vector<1x1x1xf32>
    %23 = vector.extract %22[0, 0, 0] : f32 from vector<1x1x1xf32>
    %cst_11 = arith.constant 1.000000e+00 : f32
    %24 = vector.broadcast %cst_11 : f32 to vector<2x128xf32>
    %25 = arith.divf %24, %4 : vector<2x128xf32>
    %26 = arith.mulf %6, %25 : vector<2x128xf32>
    %27 = arith.mulf %26, %26 : vector<2x128xf32>
    %28 = arith.subf %5, %3 : vector<2x128xf32>
    %29 = arith.mulf %28, %25 : vector<2x128xf32>
    %30 = arith.mulf %29, %29 : vector<2x128xf32>
    %31 = arith.addf %27, %30 : vector<2x128xf32>
    %32 = math.log %27 : vector<2x128xf32>
    %33 = arith.subf %31, %32 : vector<2x128xf32>
    %c1_i32 = arith.constant 1 : i32
    %34 = arith.muli %arg0, %c1_i32 : i32
    %35 = arith.addi %34, %arg1 : i32
    %c128_i32 = arith.constant 128 : i32
    %36 = arith.muli %35, %c128_i32 : i32
    %37 = tpu.iota {dimensions = array<i32: 1>} : vector<2x128xi32>
    %38 = vector.broadcast %36 : i32 to vector<2x128xi32>
    %39 = arith.addi %38, %37 : vector<2x128xi32>
    %c0_i32_12 = arith.constant 0 : i32
    %40 = vector.broadcast %c0_i32_12 : i32 to vector<2x128xi32>
    %41 = arith.cmpi sge, %39, %40 : vector<2x128xi32>
    %c0_13 = arith.constant 0 : index
    %c0_14 = arith.constant 0 : index
    %42 = vector.load %arg2[%c0_13, %c0_14] : memref<2x1xi32, #tpu.memory_space<vmem>>, vector<2x1xi32>
    %43 = vector.broadcast %42 : vector<2x1xi32> to vector<2x128xi32>
    %44 = arith.cmpi slt, %39, %43 : vector<2x128xi32>
    %45 = arith.andi %41, %44 : vector<2x128xi1>
    %c0_15 = arith.constant 0 : index
    %c0_16 = arith.constant 0 : index
    %46 = vector.load %arg3[%c0_15, %c0_16] : memref<2x1xf32, #tpu.memory_space<vmem>>, vector<2x1xf32>
    %cst_17 = arith.constant 0.000000e+00 : f32
    %47 = vector.shape_cast %46 : vector<2x1xf32> to vector<2x1xf32>
    %48 = vector.broadcast %47 : vector<2x1xf32> to vector<2x128xf32>
    %49 = vector.broadcast %cst_17 : f32 to vector<2x128xf32>
    %50 = arith.select %45, %48, %49 : vector<2x128xi1>, vector<2x128xf32>
    %51 = arith.mulf %33, %50 : vector<2x128xf32>
    %52 = vector.shape_cast %51 : vector<2x128xf32> to vector<1x2x128xf32>
    %cst_18 = arith.constant dense<0.000000e+00> : vector<1xf32>
    %53 = vector.multi_reduction <add>, %52, %cst_18 [1, 2] : vector<1x2x128xf32> to vector<1xf32>
    %54 = vector.shape_cast %53 : vector<1xf32> to vector<1x1x1xf32>
    %55 = vector.extract %54[0, 0, 0] : f32 from vector<1x1x1xf32>
    %56 = tpu.iota {dimensions = array<i32: 0>} : vector<8x128xi32>
    %c0_i32_19 = arith.constant 0 : i32
    %57 = vector.broadcast %c0_i32_19 : i32 to vector<8x128xi32>
    %58 = arith.cmpi eq, %56, %57 : vector<8x128xi32>
    %cst_20 = arith.constant 0.000000e+00 : f32
    %59 = vector.broadcast %55 : f32 to vector<8x128xf32>
    %60 = vector.broadcast %cst_20 : f32 to vector<8x128xf32>
    %61 = arith.select %58, %59, %60 : vector<8x128xi1>, vector<8x128xf32>
    %c1_i32_21 = arith.constant 1 : i32
    %62 = vector.broadcast %c1_i32_21 : i32 to vector<8x128xi32>
    %63 = arith.cmpi eq, %56, %62 : vector<8x128xi32>
    %cst_22 = arith.constant 0.000000e+00 : f32
    %64 = vector.broadcast %10 : f32 to vector<8x128xf32>
    %65 = vector.broadcast %cst_22 : f32 to vector<8x128xf32>
    %66 = arith.select %63, %64, %65 : vector<8x128xi1>, vector<8x128xf32>
    %67 = arith.addf %61, %66 : vector<8x128xf32>
    %c2_i32 = arith.constant 2 : i32
    %68 = vector.broadcast %c2_i32 : i32 to vector<8x128xi32>
    %69 = arith.cmpi eq, %56, %68 : vector<8x128xi32>
    %cst_23 = arith.constant 0.000000e+00 : f32
    %70 = vector.broadcast %15 : f32 to vector<8x128xf32>
    %71 = vector.broadcast %cst_23 : f32 to vector<8x128xf32>
    %72 = arith.select %69, %70, %71 : vector<8x128xi1>, vector<8x128xf32>
    %73 = arith.addf %67, %72 : vector<8x128xf32>
    %c3_i32 = arith.constant 3 : i32
    %74 = vector.broadcast %c3_i32 : i32 to vector<8x128xi32>
    %75 = arith.cmpi eq, %56, %74 : vector<8x128xi32>
    %cst_24 = arith.constant 0.000000e+00 : f32
    %76 = vector.broadcast %19 : f32 to vector<8x128xf32>
    %77 = vector.broadcast %cst_24 : f32 to vector<8x128xf32>
    %78 = arith.select %75, %76, %77 : vector<8x128xi1>, vector<8x128xf32>
    %79 = arith.addf %73, %78 : vector<8x128xf32>
    %c4_i32 = arith.constant 4 : i32
    %80 = vector.broadcast %c4_i32 : i32 to vector<8x128xi32>
    %81 = arith.cmpi eq, %56, %80 : vector<8x128xi32>
    %cst_25 = arith.constant 0.000000e+00 : f32
    %82 = vector.broadcast %23 : f32 to vector<8x128xf32>
    %83 = vector.broadcast %cst_25 : f32 to vector<8x128xf32>
    %84 = arith.select %81, %82, %83 : vector<8x128xi1>, vector<8x128xf32>
    %85 = arith.addf %79, %84 : vector<8x128xf32>
    %c0_i32_26 = arith.constant 0 : i32
    %86 = vector.broadcast %c0_i32_26 : i32 to vector<8x128xi32>
    %87 = arith.cmpi eq, %56, %86 : vector<8x128xi32>
    %c1_i32_27 = arith.constant 1 : i32
    %88 = vector.broadcast %c1_i32_27 : i32 to vector<8x128xi32>
    %89 = arith.cmpi eq, %56, %88 : vector<8x128xi32>
    %90 = arith.ori %87, %89 : vector<8x128xi1>
    %c3_i32_28 = arith.constant 3 : i32
    %91 = vector.broadcast %c3_i32_28 : i32 to vector<8x128xi32>
    %92 = arith.cmpi eq, %56, %91 : vector<8x128xi32>
    %93 = arith.ori %90, %92 : vector<8x128xi1>
    %c0_29 = arith.constant 0 : index
    %c0_30 = arith.constant 0 : index
    %c0_31 = arith.constant 0 : index
    %94 = vector.load %arg8[%c0_29, %c0_30, %c0_31] : memref<1x8x128xf32, #tpu.memory_space<vmem>>, vector<1x8x128xf32>
    %95 = vector.shape_cast %94 : vector<1x8x128xf32> to vector<8x128xf32>
    %96 = arith.addf %95, %85 : vector<8x128xf32>
    %97 = arith.maximumf %95, %85 : vector<8x128xf32>
    %98 = arith.select %93, %96, %97 : vector<8x128xi1>, vector<8x128xf32>
    %c0_32 = arith.constant 0 : index
    %c0_33 = arith.constant 0 : index
    %c0_34 = arith.constant 0 : index
    %99 = vector.load %arg8[%c0_32, %c0_33, %c0_34] : memref<1x8x128xf32, #tpu.memory_space<vmem>>, vector<1x8x128xf32>
    %100 = vector.shape_cast %99 : vector<1x8x128xf32> to vector<8x128xf32>
    %101 = vector.shape_cast %98 : vector<8x128xf32> to vector<1x8x128xf32>
    tpu.vector_store %arg8[%c0_32, %c0_33, %c0_34], %101 {strides = array<i32>} : memref<1x8x128xf32, #tpu.memory_space<vmem>>, vector<1x8x128xf32>,
    return
  }
  func.func @transform_0(%arg0: i32, %arg1: i32) -> (i32, i32) {
    %c0_i32 = arith.constant 0 : i32
    %c0_i32_0 = arith.constant 0 : i32
    %c0_i32_1 = arith.constant 0 : i32
    return %c0_i32, %c0_i32_0 : i32, i32
  }
  func.func @transform_1(%arg0: i32, %arg1: i32) -> (i32, i32) {
    %c0_i32 = arith.constant 0 : i32
    %c0_i32_0 = arith.constant 0 : i32
    %c0_i32_1 = arith.constant 0 : i32
    return %c0_i32, %c0_i32_0 : i32, i32
  }
  func.func @transform_2(%arg0: i32, %arg1: i32) -> (i32, i32) {
    %c1_i32 = arith.constant 1 : i32
    %0 = arith.muli %arg0, %c1_i32 : i32
    %1 = arith.addi %0, %arg1 : i32
    %c0_i32 = arith.constant 0 : i32
    %c0_i32_0 = arith.constant 0 : i32
    return %c0_i32, %1 : i32, i32
  }
  func.func @transform_3(%arg0: i32, %arg1: i32) -> (i32, i32) {
    %c1_i32 = arith.constant 1 : i32
    %0 = arith.muli %arg0, %c1_i32 : i32
    %1 = arith.addi %0, %arg1 : i32
    %c0_i32 = arith.constant 0 : i32
    %c0_i32_0 = arith.constant 0 : i32
    return %c0_i32, %1 : i32, i32
  }
  func.func @transform_4(%arg0: i32, %arg1: i32) -> (i32, i32) {
    %c1_i32 = arith.constant 1 : i32
    %0 = arith.muli %arg0, %c1_i32 : i32
    %1 = arith.addi %0, %arg1 : i32
    %c0_i32 = arith.constant 0 : i32
    %c0_i32_0 = arith.constant 0 : i32
    return %c0_i32, %1 : i32, i32
  }
  func.func @transform_5(%arg0: i32, %arg1: i32) -> (i32, i32) {
    %c1_i32 = arith.constant 1 : i32
    %0 = arith.muli %arg0, %c1_i32 : i32
    %1 = arith.addi %0, %arg1 : i32
    %c0_i32 = arith.constant 0 : i32
    %c0_i32_0 = arith.constant 0 : i32
    return %c0_i32, %1 : i32, i32
  }
  func.func @transform_6(%arg0: i32, %arg1: i32) -> (i32, i32, i32) {
    %c0_i32 = arith.constant 0 : i32
    %c0_i32_0 = arith.constant 0 : i32
    %c0_i32_1 = arith.constant 0 : i32
    return %arg0, %c0_i32, %c0_i32_0 : i32, i32, i32
  }
}

</mosaic_0001>

<bundles_post_ra>
// kernel: tpu_custom_call.1
= control target key start
LH: loop header
LB: loop body
LE: loop exit
PB: predicated region body
PF: predicated region fallthrough
CT: control target
= control target key end

     0   :  { %s1022_s0 = inlined_call_operand.vmem [shape: s32[2,1], index: 0, kind: input, shape index: {}]   ;;  %s1023_s1 = inlined_call_operand.vmem [shape: f32[2,1], index: 1, kind: input, shape index: {}]   ;;  %s1024_s2 = inlined_call_operand.vmem [shape: f32[2,256], index: 2, kind: input, shape index: {}]   ;;  %s1025_s3 = inlined_call_operand.vmem [shape: f32[2,256], index: 3, kind: input, shape index: {}]   ;;  %s1026_s4 = inlined_call_operand.vmem [shape: f32[2,256], index: 4, kind: input, shape index: {}]   ;;  %s1027_s5 = inlined_call_operand.hbm [shape: f32[2,256], index: 5, kind: input, shape index: {}]   ;;  %s1028_s6 = inlined_call_operand.hbm [shape: f32[2,8,128], index: 6, kind: output, shape index: {}]  }
   0x1   :  { %1029 = sst [smem:[#allocation8_spill]] %s1027_s5 }
   0x2   :  { %11 = vsyncpa [#allocation3], 0 }
   0x3   :  { %13 = vsyncpa [#allocation3 + $0x1], 0 }
   0x4   :  { %14 = vsyncpa [#allocation4], 0 }
   0x5   :  { %16 = vsyncpa [#allocation4 + $0x1], 0  ;;  %s849_s21 = smov 0   ;;  %s851_s22 = smov 0  }
   0x6   :  { %s853_s23 = smov 0   ;;  %s855_s24 = smov 0  }
   0x7   :  { %s857_s25 = smov 0   ;;  %s859_s26 = smov 0  }
   0x8 LB: > { %s605_s27 = sadd.s32 4294967295, %s809_s26   ;;  %s606_s28 = sadd.s32 4294967294, %s809_s26   ;;  %s809_s26 = sphi %s859_s26, %s22_s26   ;;  %s805_s25 = sphi %s857_s25, %s1042_s25   ;;  %s801_s24 = sphi %s855_s24, %s1041_s24   ;;  %s797_s23 = sphi %s853_s23, %s1040_s23   ;;  %s793_s22 = sphi %s851_s22, %s1039_s22   ;;  %s789_s21 = sphi %s849_s21, %s1038_s21  }
   0x9   : > { %s34_s29 = sadd.s32 1, %s805_s25  ;;  %s169_s30 = sadd.s32 1, %s797_s23 }
   0xa   : > { %p36_p0 = scmp.ge.s32.totalorder %s34_s29, 2  ;;  %p176_p1 = scmp.ne.s32.totalorder %s797_s23, %s793_s22 }
   0xb   : > { %p177_p2 = scmp.eq.s32.totalorder %s809_s26, 0  ;;  %p182_p3 = scmp.ne.s32.totalorder %s793_s22, %s789_s21 }
   0xc   : > { %s1044_s29 = smov (%p36_p0, %s34_s29), 0  ;;  %p183_p5 = scmp.eq.s32.totalorder %s605_s27, 0 }
   0xd   : > { %p890_p4 = por %p177_p2, %p176_p1  ;;  %s166_s8 = ssub.s32 %s805_s25, %s1044_s29 }
   0xe   : > { %p206_p6 = scmp.eq.s32.totalorder %s605_s27, 1  ;;  %p167_p7 = scmp.eq.s32.totalorder %s166_s8, 0 }
   0xf   : > { %p896_p8 = por %p183_p5, %p182_p3  ;;  %p212_p10 = scmp.eq.s32.totalorder %s606_s28, 1 }
  0x10   : > { %p900_p9 = por %p206_p6, %p176_p1  ;;  %p644_p13 = scmp.lt.s32.totalorder %s809_s26, 2 }
  0x11   : > { %s905_s11 = scalar_select %p167_p7, %s797_s23, %s169_s30  }
  0x12   : > { %p907_p11 = por %p212_p10, %p182_p3  ;;  %s265_s13 = sand.u32 1, %s797_s23  }
  0x13   : > { %s609_s14 = sshll.u32 %s265_s13, 1  ;;  %s610_s15 = sshll.u32 %s805_s25, 5 }
  0x14   : > { %s1033_s12 = scalar_select %p907_p11, 1, 0 }
  0x15   : > { %s1034_s5 = sld [smem:[#allocation8_spill]]  ;;  %s269_s19 = scalar_lea.vmem [#allocation2], %s609_s14 }
  0x16   : > { %s277_s20 = sshll.u32 %s269_s19, 4  ;;  %p920_p0 = pnand %p644_p13, %p890_p4  ;;  %s278_s20 = int_to_ptr.vmem [resolvable:$true] %s277_s20 }
  0x17   : > { %p611_p1 = scmp.ge.s32.totalorder %s809_s26, 1  ;;  %p282_p2 = scmp.lt.s32.totalorder %s809_s26, 3 }
  0x18   : > { %s266_s28 = scalar_lea.sflag [#allocation3], %s265_s13  ;;  %p703_p3 = pneg %p920_p0 }
  0x19   : > { %s714_s30 = scalar_lea.vmem %s278_s20, 32  ;;  %s811_s8 = smov [#allocation2]  }
  0x1a   : > { %p715_p5 = scmp.ne.s32.totalorder %s278_s20, %s714_s30 }
  0x1b   : > { %s275_s18 = scalar_lea.hbm %s1034_s5, %s610_s15  ;;  %s719_s15 = sshll.u32 %s811_s8, 4  ;;  %s720_s15 = int_to_ptr.vmem [resolvable:$false] %s719_s15 }
  0x1c   : > { %p717_p6 = pnand %p715_p5, %p703_p3  ;;  %s721_s14 = scalar_lea.vmem %s720_s15, 64 }
  0x1d   : > { %p722_p10 = scmp.lt.s32.totalorder %s278_s20, %s720_s15  ;;  %p723_p12 = scmp.lt.s32.totalorder %s721_s14, %s714_s30 }
  0x1e   : > { %p718_p7 = pneg %p717_p6 }
  0x1f   : > { %p724_p4 = por %p723_p12, %p722_p10 }
  0x21   : > { %p725_p13 = pnand %p724_p4, %p718_p7 }
  0x23   : > { %728 = shalt.err (!%p725_p13)
}
  0x24   : > { %639 = dma.hbm_to_vmem [thread:$0]  (!%p920_p0), %s275_s18, 32, %s278_s20, %s266_s28  }
  0x25   : > { %p283_p11 = pnand %p611_p1, %p282_p2 }
  0x26   : > { %s935_s7 = sand.u32 (!%p283_p11), 1, %s793_s22  }
  0x27   : > { %286 = sbr.rel (%p283_p11) target bundleno = 405 (0x195), region = 44  ;;  %s612_s13 = sshll.u32 (!%p283_p11), %s935_s7, 1 }
  0x28   : > { %s289_s16 = scalar_lea.sflag (!%p283_p11), [#allocation3], %s935_s7  ;;  %s292_s17 = scalar_lea.vmem (!%p283_p11), [#allocation2], %s612_s13 }
  0x2c   : > { %780 = dma.done.wait (%p896_p8), %s289_s16, 32  }
  0x2d   : > { %782 = vsyncadd (%p896_p8), %s289_s16, 4294967264  ;;  %p337_p12 = scmp.lt.s32.totalorder %s801_s24, 1  ;;  %v812_v0 = vmov 0   ;;  %vm364_vm0 = vcmask 1041408   ;;  %v424_v1 = vld [vmem:[%s1022_s0] sm:$0x3]  ;;  %v419_v22 = vlaneseq }
  0x2e   : > { %696 = vset.pattern.permute.xlu0 %v812_v0  ;;  %v430_v6 = vld [vmem:[%s1023_s1] sm:$0x3]  ;;  %v363_v11 = vld [vmem:[%s292_s17] sm:$0x3]  ;;  %s617_s5 = sshll.u32 %s801_s24, 7  ;;  %s613_s8 = sshll.u32 %s935_s7, 3 }
  0x2f   : > { %s338_s18 = scalar_select %p337_p12, %s801_s24, 1  ;;  %426 = vperm.xlu0 %696, %v424_v1   ;;  %v420_v23 = vand.u32 127, %v419_v22  ;;  %v421_v24 = vstv %s617_s5 }
  0x30   : > { %s980_s16 = scalar_lea.hbm %s1028_s6, %s617_s5 }
  0x31   : > { %s614_s19 = sshll.u32 %s338_s18, 1  ;;  %v422_v25 = vadd.s32 %v421_v24, %v420_v23  ;;  %s477_s18 = scalar_lea.sflag [#allocation4], %s935_s7 }
  0x32   : > { %s340_s28 = scalar_lea.vmem %s1024_s2, %s614_s19  ;;  %s352_s15 = scalar_lea.vmem %s1026_s4, %s614_s19 }
  0x33   : > { %s346_s9 = scalar_lea.vmem %s1025_s3, %s614_s19  ;;  %v360_v2 = vld [vmem:[%s340_s28] sm:$0x3]  ;;  %433 = vperm.xlu0 %696, %v430_v6   ;;  %vm423_vm2 = vcmp.ge.s32.totalorder %v422_v25, 0 }
  0x34   : > { %v362_v3 = vld [vmem:[%s352_s15] sm:$0x3]  ;;  %v365_v4 = vsel %vm364_vm0, %v360_v2, 0.0  ;;  %v375_v9 = vand.u32 2147483647, %v360_v2  ;;  %s335_s15 = scalar_lea.vmem [#allocation5], %s613_s8 }
  0x35   : > { %v361_v5 = vld [vmem:[%s346_s9] sm:$0x3]  ;;  %v410_v7 = vsub.f32 %v362_v3, %v360_v2  ;;  %366 = vadd.xlane.f32.xlu1 %v365_v4  ;;  %v449_v2 = vshrl.u32 %v419_v22, 7  ;;  %s490_s14 = sshll.u32 %s335_s15, 4  ;;  %s491_s14 = int_to_ptr.vmem [resolvable:$true] %s490_s14 }
  0x36   : > { %697 = vrcp.f32 %v361_v5  ;;  %v396_v8 = vsel %vm364_vm0, %v361_v5, -inf  ;;  %v376_v10 = vsel %vm364_vm0, %v375_v9, -inf  ;;  %v386_v19 = vsel %vm364_vm0, %v361_v5, 0.0  ;;  %s729_s20 = scalar_lea.vmem %s491_s14, 128 }
  0x37   : > { %vm453_vm4 = vcmp.eq.s32.totalorder %v449_v2, 1  ;;  %vm450_vm5 = vcmp.eq.s32.totalorder %v449_v2, 0  ;;  %vm457_vm6 = vcmp.eq.s32.totalorder %v449_v2, 2  ;;  %vm461_vm7 = vcmp.eq.s32.totalorder %v449_v2, 3  ;;  %p730_p8 = scmp.ne.s32.totalorder %s491_s14, %s729_s20 }
  0x38   : > { %vm465_vm8 = vcmp.eq.s32.totalorder %v449_v2, 4  ;;  %vm469_vm9 = vmor %vm450_vm5, %vm453_vm4 }
  0x39   : > { %397 = vmax.xlane.f32.xlu1 %v396_v8  ;;  %vm470_vm10 = vmor %vm469_vm9, %vm461_vm7  ;;  %p731_p11 = pnand %p730_p8, %p900_p9 }
  0x3b   : > { %p732_p0 = pneg %p731_p11 }
  0x3d   : > { %377 = vmax.xlane.f32.xlu1 %v376_v10 }
  0x43   : > { %v698_v12 = vpop.eup %697 }
  0x44   : > { %v408_v13 = vmul.f32 %v698_v12, %v363_v11  ;;  %v411_v14 = vmul.f32 %v698_v12, %v410_v7 }
  0x46   : > { %v409_v15 = vmul.f32 %v408_v13, %v408_v13  ;;  %v412_v16 = vmul.f32 %v411_v14, %v411_v14 }
  0x48   : > { %v413_v17 = vadd.f32 %v412_v16, %v409_v15  ;;  %699 = vlog2.f32 %v409_v15 }
  0x52   : > { %387 = vadd.xlane.f32.xlu0 %v386_v19 }
  0x55   : > { %v700_v18 = vpop.eup %699 }
  0x56   : > { %v415_v20 = vmul.f32 0.6931472, %v700_v18 }
  0x58   : > { %v416_v21 = vsub.f32 %v413_v17, %v415_v20 }
  0xaa   : > { %v427_v26 = vpop.permute.xlu0 %426 }
  0xab   : > { %vm428_vm1 = vcmp.lt.s32.totalorder %v422_v25, %v427_v26 }
  0xac   : > { %vm429_vm3 = vmand %vm423_vm2, %vm428_vm1 }
  0xae   : > { %v434_v27 = vpop.permute.xlu0 %433 }
  0xaf   : > { %v436_v28 = vsel %vm429_vm3, %v434_v27, 0.0 }
  0xb0   : > { %v437_v29 = vmul.f32 %v436_v28, %v416_v21 }
  0xb2   : > { %v438_v30 = vsel %vm364_vm0, %v437_v29, 0.0 }
  0xb3   : > { %439 = vadd.xlane.f32.xlu1 %v438_v30 }
  0xbe   : > { %v367_v31 = vpop.xlane.xlu1 %366 }
  0xbf   : > { %v368_v32 = vrot.slane %v367_v31, 4 }
  0xc1   : > { %v369_v33 = vadd.f32 %v368_v32, %v367_v31 }
  0xc2   : > { %v398_v34 = vpop.xlane.xlu1 %397 }
  0xc3   : > { %v370_v35 = vrot.slane %v369_v33, 2  ;;  %v399_v46 = vrot.slane %v398_v34, 4 }
  0xc5   : > { %v371_v36 = vadd.f32 %v370_v35, %v369_v33  ;;  %v400_v47 = vmax.f32 %v398_v34, %v399_v46 }
  0xc6   : > { %v378_v37 = vpop.xlane.xlu1 %377 }
  0xc7   : > { %v379_v38 = vrot.slane %v378_v37, 4  ;;  %v372_v39 = vrot.slane %v371_v36, 1  ;;  %v401_v48 = vrot.slane %v400_v47, 2 }
  0xc9   : > { %v380_v40 = vmax.f32 %v378_v37, %v379_v38  ;;  %v373_v41 = vadd.f32 %v372_v39, %v371_v36  ;;  %v402_v51 = vmax.f32 %v400_v47, %v401_v48 }
  0xcb   : > { %v381_v42 = vrot.slane %v380_v40, 2  ;;  %622 = vpush %v373_v41  ;;  %v403_v54 = vrot.slane %v402_v51, 1 }
  0xcd   : > { %v382_v43 = vmax.f32 %v380_v40, %v381_v42  ;;  %v404_v57 = vmax.f32 %v402_v51, %v403_v54 }
  0xcf   : > { %v383_v44 = vrot.slane %v382_v43, 1 }
  0xd1   : > { %v384_v45 = vmax.f32 %v382_v43, %v383_v44 }
  0xd3   : > { %624 = vpush %v384_v45 }
  0xdb   : > { %v388_v49 = vpop.xlane.xlu0 %387 }
  0xdc   : > { %v389_v50 = vrot.slane %v388_v49, 4 }
  0xde   : > { %v390_v52 = vadd.f32 %v389_v50, %v388_v49 }
  0xe0   : > { %v391_v53 = vrot.slane %v390_v52, 2 }
  0xe2   : > { %v392_v55 = vadd.f32 %v391_v53, %v390_v52 }
  0xe4   : > { %v393_v56 = vrot.slane %v392_v55, 1 }
  0xe6   : > { %v394_v58 = vadd.f32 %v393_v56, %v392_v55 }
  0xe8   : > { %626 = vpush %v394_v58 }
  0xe9   : > { %628 = vpush %v404_v57 }
  0xfc   : > { %s623_s17 = spop %622 }
  0xfd   : > { %v454_v3 = vstv %s623_s17  ;;  %s813_s17 = smov [#allocation5]  }
  0xfe   : > { %v455_v6 = vsel %vm453_vm4, %v454_v3, 0.0 }
 0x104   : > { %s625_s19 = spop %624 }
 0x105   : > { %v458_v4 = vstv %s625_s19  ;;  %s733_s19 = sshll.u32 %s813_s17, 4  ;;  %s734_s19 = int_to_ptr.vmem [resolvable:$false] %s733_s19 }
 0x106   : > { %v459_v10 = vsel %vm457_vm6, %v458_v4, 0.0  ;;  %p736_p1 = scmp.lt.s32.totalorder %s491_s14, %s734_s19 }
 0x119   : > { %s627_s27 = spop %626 }
 0x11a   : > { %s629_s28 = spop %628  ;;  %v462_v8 = vstv %s627_s27  ;;  %s735_s27 = scalar_lea.vmem %s734_s19, 256 }
 0x11b   : > { %v466_v11 = vstv %s629_s28  ;;  %v463_v13 = vsel %vm461_vm7, %v462_v8, 0.0  ;;  %p737_p2 = scmp.lt.s32.totalorder %s735_s27, %s729_s20 }
 0x11c   : > { %v467_v15 = vsel %vm465_vm8, %v466_v11, 0.0 }
 0x11d   : > { %p738_p3 = por %p737_p2, %p736_p1 }
 0x11f   : > { %p739_p5 = pnand %p738_p3, %p732_p0 }
 0x13c   : > { %v440_v59 = vpop.xlane.xlu1 %439 }
 0x13d   : > { %v441_v60 = vrot.slane %v440_v59, 4 }
 0x13f   : > { %v442_v61 = vadd.f32 %v441_v60, %v440_v59 }
 0x141   : > { %v443_v62 = vrot.slane %v442_v61, 2 }
 0x143   : > { %v444_v63 = vadd.f32 %v443_v62, %v442_v61 }
 0x145   : > { %v445_v0 = vrot.slane %v444_v63, 1 }
 0x147   : > { %v446_v1 = vadd.f32 %v445_v0, %v444_v63 }
 0x149   : > { %630 = vpush %v446_v1 }
 0x17a   : > { %s631_s30 = spop %630 }
 0x17b   : > { %v451_v5 = vstv %s631_s30 }
 0x17c   : > { %v452_v7 = vsel %vm450_vm5, %v451_v5, 0.0 }
 0x17d   : > { %v456_v9 = vadd.f32 %v455_v6, %v452_v7 }
 0x17f   : > { %v460_v12 = vadd.f32 %v459_v10, %v456_v9 }
 0x181   : > { %v464_v14 = vadd.f32 %v463_v13, %v460_v12 }
 0x183   : > { %v468_v16 = vadd.f32 %v467_v15, %v464_v14 }
 0x185   : > { %v473_v17 = vmax.f32 %v468_v16, 0.0 }
 0x187   : > { %v474_v18 = vsel %vm470_vm10, %v468_v16, %v473_v17 }
 0x188   : > { %475 = vst [vmem:[%s335_s15] sm:$0xff] %v474_v18 }
 0x189   : > { %742 = shalt.err (!%p739_p5)
}
 0x18a   : > { %s743_s24 = scalar_lea.hbm %s980_s16, 128  ;;  %s747_s28 = scalar_lea.hbm %s1028_s6, 256 }
 0x18b   : > { %p744_p6 = scmp.ne.s32.totalorder %s980_s16, %s743_s24  ;;  %p748_p4 = scmp.lt.s32.totalorder %s980_s16, %s1028_s6 }
 0x18c   : > { %p749_p13 = scmp.lt.s32.totalorder %s747_s28, %s743_s24 }
 0x18d   : > { %p745_p7 = pnand %p744_p6, %p900_p9 }
 0x18e   : > { %p750_p12 = por %p749_p13, %p748_p4 }
 0x18f   : > { %p746_p10 = pneg %p745_p7 }
 0x191   : > { %p751_p8 = pnand %p750_p12, %p746_p10 }
 0x193   : > { %754 = shalt.err (!%p751_p8)
}
 0x194   : > { %634 = dma.vmem_to_hbm [thread:$0]  (%p900_p9), %s491_s14, 128, %s980_s16, %s477_s18  }
 0x195 PF: > { %s502_s15 = sand.u32 1, %s789_s21   ;;  %p1036_p11 = scmp.ne.s32.totalorder %s1033_s12, 0 }
 0x196   : > { %p1037_p0 = scmp.ge.s32.totalorder %s809_s26, 2  ;;  %s503_s13 = scalar_lea.sflag [#allocation4], %s502_s15 }
 0x198   : > { %p641_p1 = pnand %p1037_p0, %p1036_p11 }
 0x19a   : > { %p642_p2 = pneg %p641_p1 }
 0x19c   : > { %784 = dma.done.wait (%p642_p2), %s503_s13, 128  }
 0x19d   : > { %786 = vsyncadd (%p642_p2), %s503_s13, 4294967168  ;;  %s22_s26 = sadd.s32 1, %s809_s26   ;;  %s1038_s21 = smov %s793_s22 }
 0x19e   : > { %p19_p3 = scmp.ge.s32.totalorder %s22_s26, 4   ;;  %s1039_s22 = smov %s797_s23 }
 0x19f   : > { %s1040_s23 = smov %s905_s11  ;;  %s1041_s24 = smov %s805_s25 }
 0x1a0   : > { %s1042_s25 = smov %s1044_s29  ;;  %21 = sbr.rel (!%p19_p3) target bundleno = 8 (0x8), region = 102 }
 0x1a5   :  { %508 = vsyncpa [#allocation3], 1 }
 0x1a6   :  { %510 = vsyncpa [#allocation3 + $0x1], 1 }
 0x1a7   :  { %511 = vsyncpa [#allocation4], 1 }
 0x1a8   :  { %513 = vsyncpa [#allocation4 + $0x1], 1 }

</bundles_post_ra>
